<compile_context>
chip_gen: v7x
topology: tpu7x:2x2x1
jax: 0.10.0
libtpu: 0.0.40
codegen_flags: <defaults>
</compile_context>

<pallas_src>
import functools
import math

import jax
import jax.numpy as jnp
from jax import lax
from jax.experimental import pallas as pl
from jax.experimental.pallas import tpu as pltpu

_LANES = 128
_SUBLANES = 8
_DEFAULT_BLOCK_ROWS = 8192  # (8192, 128) f32 = 4 MiB per input block


def _sublane_multiple(dtype):
    """Packed-sublane row multiple for a dtype (8 f32, 16 bf16, 32 int8)."""
    itemsize = jnp.dtype(dtype).itemsize
    if itemsize >= 4:
        return _SUBLANES
    return _SUBLANES * (4 // itemsize)


def _num_tensorcores():
    """Best-effort per-chip TensorCore count (2 on v7x); defaults to 1."""
    # TODO(synk): if TpuInfo exposes a reliable per-chip TC-count field on the
    # installed jax version, this will pick it up; otherwise single-core.
    try:
        info = pltpu.get_tpu_info()
    except Exception:
        return 1
    for attr in ('num_tensorcores', 'tensorcores_per_chip',
                 'num_cores_per_chip', 'cores_per_chip', 'num_tensor_cores'):
        v = getattr(info, attr, None)
        if isinstance(v, int) and v >= 1:
            return min(v, 2)
    return 1


def _elemwise_smooth_l1(pred, target, weight):
    """Plain-JAX smooth-L1 (beta=1.0), used for 'none' and the ragged tail."""
    d = pred.astype(jnp.float32) - target.astype(jnp.float32)
    ad = jnp.abs(d)
    loss = jnp.where(ad < 1.0, 0.5 * d * d, ad - 0.5)
    if weight is not None:
        loss = loss * weight.astype(jnp.float32)
    return loss


def _smooth_l1_kernel(*refs, steps, block_rows, valid_rows, needs_mask,
                      has_weight):
    """Accumulates per-core (8, 128) partial sums of smooth_l1(pred, target)."""
    if has_weight:
        pred_ref, target_ref, w_ref, out_ref = refs
    else:
        pred_ref, target_ref, out_ref = refs
        w_ref = None

    p = pl.program_id(0)   # core axis (size 1 on single-TC chips)
    i = pl.program_id(1)   # reduction axis

    @pl.when(i == 0)
    def _():
        out_ref[...] = jnp.zeros_like(out_ref)

    # In-kernel upcast: HBM traffic stays in the caller's dtype.
    d = pred_ref[...].astype(jnp.float32) - target_ref[...].astype(jnp.float32)
    ad = jnp.abs(d)
    # PyTorch F.smooth_l1_loss with default beta=1.0.
    loss = jnp.where(ad < 1.0, 0.5 * d * d, ad - 0.5)
    if has_weight:
        loss = loss * w_ref[...].astype(jnp.float32)

    def row_sum(x):
        # Reduce only along the row axis (cheap VPU adds, no per-step
        # cross-lane XLU reduction); the final (n_cores*8,128) reduce happens
        # once in the wrapper.
        return jnp.sum(
            x.reshape(block_rows // _SUBLANES, _SUBLANES, _LANES), axis=0)

    if needs_mask:
        block_idx = p * steps + i
        block_end = (block_idx + 1) * block_rows

        # Fast path: fully-valid interior blocks skip the mask entirely.
        @pl.when(block_end <= valid_rows)
        def _():
            out_ref[...] += row_sum(loss)

        # Slow path: the boundary block and any clamped out-of-range blocks.
        @pl.when(block_end > valid_rows)
        def _():
            start = block_idx * block_rows
            row_ids = lax.broadcasted_iota(jnp.int32, (block_rows, _LANES), 0)
            masked = jnp.where(start + row_ids < valid_rows, loss, 0.0)
            out_ref[...] += row_sum(masked)
    else:
        out_ref[...] += row_sum(loss)


def smooth_l1_loss(pred, target, weight=None, *, loss_weight=1.0,
                   reduction='mean', block_rows=_DEFAULT_BLOCK_ROWS,
                   n_cores=None):
    """Pallas implementation of basicsr SmoothL1Loss.forward.

    pred/target/weight: (N, C, H, W). Returns a scalar for reduction in
    {'mean', 'sum'}, and the full loss map for 'none'.
    """
    if reduction not in ('none', 'mean', 'sum'):
        raise ValueError(f'Unsupported reduction mode: {reduction}.')

    if reduction == 'none':
        # TODO(synk): 'none' returns the full (N,C,H,W) loss map — no reduction
        # hot-loop to fuse, keep it in plain JAX.
        return loss_weight * _elemwise_smooth_l1(pred, target, weight)

    total = math.prod(pred.shape)
    has_weight = weight is not None
    full_ops = [pred, target] + ([weight] if has_weight else [])
    flats = [x.reshape(-1) for x in full_ops]          # free (contiguous)

    # Align the kernel region to the packed-sublane tile of the widest-packing
    # dtype (8 rows f32, 16 bf16, 32 int8) so every block is native-tileable.
    row_align = max(_sublane_multiple(x.dtype) for x in full_ops)
    chunk = row_align * _LANES
    main_rows = (total // chunk) * row_align
    main_total = main_rows * _LANES
    tail_n = total - main_total                        # < row_align * 128

    acc = jnp.zeros((), jnp.float32)

    if main_rows > 0:
        rows = main_rows

        def prefix(f):
            # Common case (aligned total): full-extent, no copy.  Odd case:
            # a prefix slice replaces the old full jnp.pad copy.
            return f if main_total == total else lax.slice(f, (0,), (main_total,))

        ops = [prefix(f).reshape(rows, _LANES) for f in flats]

        br = min(rows, pl.cdiv(block_rows, row_align) * row_align)
        grid_blocks = pl.cdiv(rows, br)

        if n_cores is None:
            n_cores_eff = _num_tensorcores()
        else:
            n_cores_eff = max(1, int(n_cores))
        n_cores_eff = min(n_cores_eff, grid_blocks)

        steps = pl.cdiv(grid_blocks, n_cores_eff)
        covered_rows = n_cores_eff * steps * br
        needs_mask = covered_rows != rows
        last_block = grid_blocks - 1

        def in_index(p, i):
            # Clamp fully out-of-range blocks (grid_blocks % n_cores != 0) onto
            # the last valid block; the gated in-kernel mask zeroes them.
            return (jnp.minimum(p * steps + i, last_block), 0)

        in_spec = pl.BlockSpec((br, _LANES), in_index)
        out_spec = pl.BlockSpec((_SUBLANES, _LANES), lambda p, i: (p, 0))

        kernel = functools.partial(
            _smooth_l1_kernel, steps=steps, block_rows=br, valid_rows=rows,
            needs_mask=needs_mask, has_weight=has_weight)

        in_bytes = sum(int(op.size) * op.dtype.itemsize for op in ops)
        cost = pl.CostEstimate(flops=6 * main_total, transcendentals=0,
                               bytes_accessed=in_bytes)

        # 2 pipeline buffers per input block, plus headroom for intermediates;
        # cap at 64 MiB so the limit also fits v7x's physical VMEM.
        block_bytes = sum(br * _LANES * op.dtype.itemsize for op in ops)
        vmem_limit = int(min(max(2 * block_bytes + 16 * 1024 * 1024,
                                 32 * 1024 * 1024), 64 * 1024 * 1024))

        # TODO(synk): on v7x, verify in xprof that the leading "parallel" axis
        # really shards across both TensorCores; if not, switch axis 0 to
        # pltpu.CORE_PARALLEL (or pl.core_map over a 2-core mesh).
        partials = pl.pallas_call(
            kernel,
            out_shape=jax.ShapeDtypeStruct((n_cores_eff * _SUBLANES, _LANES),
                                           jnp.float32),
            grid=(n_cores_eff, steps),
            in_specs=[in_spec] * len(ops),
            out_specs=out_spec,
            compiler_params=pltpu.CompilerParams(
                dimension_semantics=("parallel", "arbitrary"),
                vmem_limit_bytes=vmem_limit),
            cost_estimate=cost,
        )(*ops)
        acc = jnp.sum(partials)

    if tail_n > 0:
        # Ragged tail (< row_align*128 elements) in plain JAX — avoids the old
        # full-tensor jnp.pad copy on odd-sized inputs.
        tails = [f[main_total:] for f in flats]
        tail_w = tails[2] if has_weight else None
        acc = acc + jnp.sum(_elemwise_smooth_l1(tails[0], tails[1], tail_w))

    denom = float(total) if reduction == 'mean' else 1.0
    return acc * (float(loss_weight) / denom)


def _reference(pred, target, weight=None, loss_weight=1.0, reduction='mean'):
    loss = _elemwise_smooth_l1(pred, target, weight)
    if reduction == 'mean':
        return loss_weight * jnp.mean(loss)
    return loss_weight * jnp.sum(loss)


if __name__ == "__main__":
    key = jax.random.PRNGKey(0)
    k1, k2, k3 = jax.random.split(key, 3)

    # 1) default config: (2,4,16,16), mean, no weight, default blocks.
    N, C, H, W = 2, 4, 16, 16
    pred = jax.random.normal(k1, (N, C, H, W), dtype=jnp.float32)
    target = jax.random.normal(k2, (N, C, H, W), dtype=jnp.float32)
    weight = jax.random.uniform(k3, (N, C, H, W), dtype=jnp.float32)

    out = smooth_l1_loss(pred, target, loss_weight=1.0, reduction='mean')
    out = jax.block_until_ready(out)
    ref = _reference(pred, target, loss_weight=1.0, reduction='mean')
    assert jnp.allclose(out, ref, rtol=1e-5, atol=1e-6), (out, ref)

    # 2) weighted + sum.
    out_w = smooth_l1_loss(pred, target, weight, loss_weight=0.5,
                           reduction='sum')
    out_w = jax.block_until_ready(out_w)
    ref_w = _reference(pred, target, weight, loss_weight=0.5, reduction='sum')
    assert jnp.allclose(out_w, ref_w, rtol=1e-5, atol=1e-5), (out_w, ref_w)

    # 3) forced 2-core split with clamped (fully-masked) tail block.
    p3 = jax.random.normal(k1, (2, 4, 16, 24), dtype=jnp.float32)
    t3 = jax.random.normal(k2, (2, 4, 16, 24), dtype=jnp.float32)
    out3 = smooth_l1_loss(p3, t3, reduction='mean', block_rows=8, n_cores=2)
    out3 = jax.block_until_ready(out3)
    ref3 = _reference(p3, t3, reduction='mean')
    assert jnp.allclose(out3, ref3, rtol=1e-5, atol=1e-6), (out3, ref3)

    # 4) single-core straddling (partially-masked) last block.
    out4 = smooth_l1_loss(p3, t3, reduction='sum', block_rows=16, n_cores=1)
    out4 = jax.block_until_ready(out4)
    ref4 = _reference(p3, t3, reduction='sum')
    assert jnp.allclose(out4, ref4, rtol=1e-5, atol=1e-5), (out4, ref4)

    # 5) odd total (not a multiple of 1024): kernel on aligned prefix + JAX tail.
    p5 = jax.random.normal(k1, (2, 4, 16, 17), dtype=jnp.float32)
    t5 = jax.random.normal(k2, (2, 4, 16, 17), dtype=jnp.float32)
    out5 = smooth_l1_loss(p5, t5, loss_weight=2.0, reduction='sum')
    out5 = jax.block_until_ready(out5)
    ref5 = _reference(p5, t5, loss_weight=2.0, reduction='sum')
    assert jnp.allclose(out5, ref5, rtol=1e-5, atol=1e-4), (out5, ref5)

    # 6) tiny odd tensor (below one aligned chunk): pure plain-JAX tail path.
    p6 = jax.random.normal(k1, (2, 3, 7, 9), dtype=jnp.float32)
    t6 = jax.random.normal(k2, (2, 3, 7, 9), dtype=jnp.float32)
    w6 = jax.random.uniform(k3, (2, 3, 7, 9), dtype=jnp.float32)
    out6 = smooth_l1_loss(p6, t6, w6, loss_weight=2.0, reduction='sum')
    out6 = jax.block_until_ready(out6)
    ref6 = _reference(p6, t6, w6, loss_weight=2.0, reduction='sum')
    assert jnp.allclose(out6, ref6, rtol=1e-5, atol=1e-5), (out6, ref6)

    # 7) bf16 inputs: packed-sublane row alignment (16) + in-kernel f32 upcast.
    p7 = pred.astype(jnp.bfloat16)
    t7 = target.astype(jnp.bfloat16)
    out7 = smooth_l1_loss(p7, t7, reduction='mean')
    out7 = jax.block_until_ready(out7)
    ref7 = _reference(p7, t7, reduction='mean')
    assert jnp.allclose(out7, ref7, rtol=1e-4, atol=1e-5), (out7, ref7)

    print("KERNEL_OK")
</pallas_src>

<mosaic_0001>
module attributes {stable_mosaic.version = 11 : i64} {
  func.func @_smooth_l1_kernel(%arg0: i32, %arg1: i32, %arg2: memref<16x128xf32, #tpu.memory_space<vmem>>, %arg3: memref<16x128xf32, #tpu.memory_space<vmem>>, %arg4: memref<8x128xf32, #tpu.memory_space<vmem>>) attributes {dimension_semantics = [#tpu.dimension_semantics<parallel>, #tpu.dimension_semantics<arbitrary>], iteration_bounds = array<i64: 1, 1>, scalar_prefetch = 0 : i64, scratch_operands = 0 : i64, tpu.core_type = #tpu.core_type<tc>, window_params = [{transform_indices = @transform_0, window_bounds = array<i64: 16, 128>}, {transform_indices = @transform_1, window_bounds = array<i64: 16, 128>}, {transform_indices = @transform_2, window_bounds = array<i64: 8, 128>}]} {
    %c0_i32 = arith.constant 0 : i32
    %0 = arith.cmpi eq, %arg1, %c0_i32 : i32
    %1 = arith.extui %0 : i1 to i32
    %c0_i32_0 = arith.constant 0 : i32
    %2 = arith.cmpi ne, %1, %c0_i32_0 : i32
    scf.if %2 {
      %cst_11 = arith.constant 0.000000e+00 : f32
      %20 = vector.broadcast %cst_11 : f32 to vector<8x128xf32>
      %c0_12 = arith.constant 0 : index
      %c0_13 = arith.constant 0 : index
      %21 = vector.load %arg4[%c0_12, %c0_13] : memref<8x128xf32, #tpu.memory_space<vmem>>, vector<8x128xf32>
      tpu.vector_store %arg4[%c0_12, %c0_13], %20 {strides = array<i32>} : memref<8x128xf32, #tpu.memory_space<vmem>>, vector<8x128xf32>,
    } else {
    }
    %c0 = arith.constant 0 : index
    %c0_1 = arith.constant 0 : index
    %3 = vector.load %arg2[%c0, %c0_1] : memref<16x128xf32, #tpu.memory_space<vmem>>, vector<16x128xf32>
    %c0_2 = arith.constant 0 : index
    %c0_3 = arith.constant 0 : index
    %4 = vector.load %arg3[%c0_2, %c0_3] : memref<16x128xf32, #tpu.memory_space<vmem>>, vector<16x128xf32>
    %5 = arith.subf %3, %4 : vector<16x128xf32>
    %6 = math.absf %5 : vector<16x128xf32>
    %cst = arith.constant 1.000000e+00 : f32
    %7 = vector.broadcast %cst : f32 to vector<16x128xf32>
    %8 = arith.cmpf olt, %6, %7 : vector<16x128xf32>
    %cst_4 = arith.constant 5.000000e-01 : f32
    %9 = vector.broadcast %cst_4 : f32 to vector<16x128xf32>
    %10 = arith.mulf %9, %5 : vector<16x128xf32>
    %11 = arith.mulf %10, %5 : vector<16x128xf32>
    %cst_5 = arith.constant 5.000000e-01 : f32
    %12 = vector.broadcast %cst_5 : f32 to vector<16x128xf32>
    %13 = arith.subf %6, %12 : vector<16x128xf32>
    %14 = arith.select %8, %11, %13 : vector<16x128xi1>, vector<16x128xf32>
    %c0_6 = arith.constant 0 : index
    %c0_7 = arith.constant 0 : index
    %15 = vector.load %arg4[%c0_6, %c0_7] : memref<8x128xf32, #tpu.memory_space<vmem>>, vector<8x128xf32>
    %16 = vector.shape_cast %14 : vector<16x128xf32> to vector<2x8x128xf32>
    %cst_8 = arith.constant dense<0.000000e+00> : vector<8x128xf32>
    %17 = vector.multi_reduction <add>, %16, %cst_8 [0] : vector<2x8x128xf32> to vector<8x128xf32>
    %18 = arith.addf %15, %17 : vector<8x128xf32>
    %c0_9 = arith.constant 0 : index
    %c0_10 = arith.constant 0 : index
    %19 = vector.load %arg4[%c0_9, %c0_10] : memref<8x128xf32, #tpu.memory_space<vmem>>, vector<8x128xf32>
    tpu.vector_store %arg4[%c0_9, %c0_10], %18 {strides = array<i32>} : memref<8x128xf32, #tpu.memory_space<vmem>>, vector<8x128xf32>,
    return
  }
  func.func @transform_0(%arg0: i32, %arg1: i32) -> (i32, i32) {
    %c1_i32 = arith.constant 1 : i32
    %0 = arith.muli %arg0, %c1_i32 : i32
    %1 = arith.addi %0, %arg1 : i32
    %c0_i32 = arith.constant 0 : i32
    %2 = arith.minsi %1, %c0_i32 : i32
    %c0_i32_0 = arith.constant 0 : i32
    %c0_i32_1 = arith.constant 0 : i32
    return %2, %c0_i32_0 : i32, i32
  }
  func.func @transform_1(%arg0: i32, %arg1: i32) -> (i32, i32) {
    %c1_i32 = arith.constant 1 : i32
    %0 = arith.muli %arg0, %c1_i32 : i32
    %1 = arith.addi %0, %arg1 : i32
    %c0_i32 = arith.constant 0 : i32
    %2 = arith.minsi %1, %c0_i32 : i32
    %c0_i32_0 = arith.constant 0 : i32
    %c0_i32_1 = arith.constant 0 : i32
    return %2, %c0_i32_0 : i32, i32
  }
  func.func @transform_2(%arg0: i32, %arg1: i32) -> (i32, i32) {
    %c0_i32 = arith.constant 0 : i32
    %c0_i32_0 = arith.constant 0 : i32
    return %arg0, %c0_i32 : i32, i32
  }
}

</mosaic_0001>

<bundles_post_ra>
// kernel: tpu_custom_call.1
= control target key start
LH: loop header
LB: loop body
LE: loop exit
PB: predicated region body
PF: predicated region fallthrough
CT: control target
= control target key end

     0   :  { %7 = vsyncpa [#allocation3], 0  ;;  %s243_s0 = inlined_call_operand.hbm [shape: f32[16,128], index: 0, kind: input, shape index: {}]   ;;  %s244_s1 = inlined_call_operand.hbm [shape: f32[16,128], index: 1, kind: input, shape index: {}]   ;;  %s245_s2 = inlined_call_operand.hbm [shape: f32[8,128], index: 2, kind: output, shape index: {}]  }
   0x1   :  { %8 = vsyncpa [#allocation6], 0 }
   0x2   :  { %9 = vsyncpa [#allocation4], 0  ;;  %s187_s9 = smov [#allocation2]   ;;  %s115_s13 = scalar_lea.hbm %s243_s0, 256 }
   0x3   :  { %s21_s10 = sshll.u32 %s187_s9, 4  ;;  %p116_p0 = scmp.ne.s32.totalorder %s243_s0, %s115_s13  ;;  %s22_s10 = int_to_ptr.vmem [resolvable:$true] %s21_s10 }
   0x4   :  { %p119_p1 = scmp.lt.u32.totalorder %s115_s13, %s243_s0 }
   0x6   :  { %p121_p2 = pnand %p119_p1, %p116_p0 }
   0x8   :  { %124 = shalt.err (!%p121_p2)
}
   0x9   :  { %s125_s18 = scalar_lea.vmem %s22_s10, 256  ;;  %p130_p4 = scmp.lt.s32.totalorder %s22_s10, %s22_s10 }
   0xa   :  { %p126_p3 = scmp.ne.s32.totalorder %s22_s10, %s125_s18  ;;  %p131_p5 = scmp.lt.s32.totalorder %s125_s18, %s125_s18 }
   0xc   :  { %p132_p6 = por %p131_p5, %p130_p4 }
   0xe   :  { %p133_p7 = pnand %p132_p6, %p126_p3 }
  0x10   :  { %136 = shalt.err (!%p133_p7)
}
  0x11   :  { %s188_s19 = smov 128   ;;  %s189_s20 = smov 8  }
  0x12   :  { %27 = dma.hbm_to_vmem [thread:$0]  %s243_s0, 256, %s22_s10, [#allocation3], %s188_s19, %s188_s19, %s189_s20  }
  0x13   :  { %s190_s23 = smov [#allocation5]   ;;  %s137_s27 = scalar_lea.hbm %s244_s1, 256 }
  0x14   :  { %s39_s24 = sshll.u32 %s190_s23, 4  ;;  %p138_p8 = scmp.ne.s32.totalorder %s244_s1, %s137_s27  ;;  %s40_s24 = int_to_ptr.vmem [resolvable:$true] %s39_s24 }
  0x15   :  { %p141_p9 = scmp.lt.u32.totalorder %s137_s27, %s244_s1 }
  0x17   :  { %p143_p10 = pnand %p141_p9, %p138_p8 }
  0x19   :  { %146 = shalt.err (!%p143_p10)
}
  0x1a   :  { %s147_s4 = scalar_lea.vmem %s40_s24, 256  ;;  %p152_p12 = scmp.lt.s32.totalorder %s40_s24, %s40_s24 }
  0x1b   :  { %p148_p11 = scmp.ne.s32.totalorder %s40_s24, %s147_s4  ;;  %p153_p13 = scmp.lt.s32.totalorder %s147_s4, %s147_s4 }
  0x1d   :  { %p154_p0 = por %p153_p13, %p152_p12 }
  0x1f   :  { %p155_p1 = pnand %p154_p0, %p148_p11 }
  0x21   :  { %158 = shalt.err (!%p155_p1)
}
  0x22   :  { %45 = dma.hbm_to_vmem [thread:$0]  %s244_s1, 256, %s40_s24, [#allocation6], %s188_s19, %s188_s19, %s189_s20  }
  0x23   :  { %181 = dma.done.wait [#allocation3], 256  }
  0x24   :  { %182 = vsyncadd [#allocation3], 4294967040 }
  0x25   :  { %183 = dma.done.wait [#allocation6], 256  }
  0x26   :  { %184 = vsyncadd [#allocation6], 4294967040  ;;  %v65_v0 = vld [vmem:[#allocation2] sm:$0xff]  ;;  %v66_v1 = vld [vmem:[#allocation2 + $0x8] sm:$0xff]  ;;  %s191_s1 = smov [#allocation7]  }
  0x27   :  { %v67_v2 = vld [vmem:[#allocation5] sm:$0xff]  ;;  %v68_v3 = vld [vmem:[#allocation5 + $0x8] sm:$0xff]  ;;  %s93_s6 = sshll.u32 %s191_s1, 4  ;;  %s94_s6 = int_to_ptr.vmem [resolvable:$true] %s93_s6 }
  0x28   :  { %v69_v4 = vsub.f32 %v65_v0, %v67_v2  ;;  %v70_v5 = vsub.f32 %v66_v1, %v68_v3  ;;  %s159_s7 = scalar_lea.vmem %s94_s6, 128  ;;  %p164_p3 = scmp.lt.s32.totalorder %s94_s6, %s94_s6 }
  0x29   :  { %p160_p2 = scmp.ne.s32.totalorder %s94_s6, %s159_s7  ;;  %p165_p4 = scmp.lt.s32.totalorder %s159_s7, %s159_s7 }
  0x2a   :  { %v71_v6 = vand.u32 2147483647, %v69_v4  ;;  %v75_v7 = vmul.f32 0.5, %v69_v4  ;;  %v72_v8 = vand.u32 2147483647, %v70_v5  ;;  %v76_v9 = vmul.f32 0.5, %v70_v5 }
  0x2b   :  { %p166_p5 = por %p165_p4, %p164_p3 }
  0x2c   :  { %vm73_vm0 = vcmp.lt.f32.partialorder %v71_v6, 1.0  ;;  %v77_v10 = vmul.f32 %v75_v7, %v69_v4  ;;  %v107_v11 = vadd.f32 -0.5, %v71_v6  ;;  %vm74_vm1 = vcmp.lt.f32.partialorder %v72_v8, 1.0 }
  0x2d   :  { %v78_v12 = vmul.f32 %v76_v9, %v70_v5  ;;  %v108_v13 = vadd.f32 -0.5, %v72_v8  ;;  %p167_p6 = pnand %p166_p5, %p160_p2 }
  0x2e   :  { %v81_v14 = vsel %vm73_vm0, %v77_v10, %v107_v11 }
  0x2f   :  { %v82_v15 = vsel %vm74_vm1, %v78_v12, %v108_v13 }
  0x30   :  { %v84_v16 = vadd.f32 %v82_v15, %v81_v14 }
  0x32   :  { %86 = vst [vmem:[#allocation7] sm:$0xff] %v84_v16 }
  0x33   :  { %170 = shalt.err (!%p167_p6)
}
  0x34   :  { %s171_s10 = scalar_lea.hbm %s245_s2, 128 }
  0x35   :  { %p172_p7 = scmp.ne.s32.totalorder %s245_s2, %s171_s10  ;;  %p175_p8 = scmp.lt.u32.totalorder %s171_s10, %s245_s2 }
  0x37   :  { %p177_p9 = pnand %p175_p8, %p172_p7 }
  0x39   :  { %180 = shalt.err (!%p177_p9)
}
  0x3a   :  { %96 = dma.vmem_to_hbm [thread:$0]  %s94_s6, 128, %s245_s2, [#allocation4]  }
  0x3b   :  { %185 = dma.done.wait [#allocation4], 128  }
  0x3c   :  { %186 = vsyncadd [#allocation4], 4294967168 }
  0x3d   :  { %100 = vsyncpa [#allocation3], 1 }
  0x3e   :  { %101 = vsyncpa [#allocation6], 1 }
  0x3f   :  { %102 = vsyncpa [#allocation4], 1 }

</bundles_post_ra>
